<compile_context>
chip_gen: v7x
topology: tpu7x:2x2x1
jax: 0.10.0
libtpu: 0.0.40
codegen_flags: <defaults>
</compile_context>

<pallas_src>
import jax
import jax.numpy as jnp
import numpy as np
from jax.experimental import pallas as pl
from jax.experimental.pallas import tpu as pltpu


_VMEM_LIMIT = 48 * 1024 * 1024  # <= v7x physical VMEM (64 MiB) with headroom


# ---------------------------------------------------------------------------
# Kernels
# ---------------------------------------------------------------------------
def _conv12(x_ref, w1_ref, b1_ref, w2_ref, b2_ref):
    """Shared conv1 + relu + conv2 on one (C, Nt) tile -> (256, Nt) f32.

    x_ref:  (1, C, Nt) f32
    w1_ref: (128, C)   bf16    b1_ref: (128, 1) f32
    w2_ref: (256, 128) bf16    b2_ref: (256, 1) f32
    """
    x = x_ref[0].astype(jnp.bfloat16)                                  # (C, Nt)
    h1 = jnp.dot(w1_ref[...], x,
                 preferred_element_type=jnp.float32) + b1_ref[...]     # (128, Nt)
    h1 = jnp.maximum(h1, 0.0)
    pf = jnp.dot(w2_ref[...], h1.astype(jnp.bfloat16),
                 preferred_element_type=jnp.float32) + b2_ref[...]     # (256, Nt)
    return pf


def _pass1_kernel(x_ref, w1_ref, b1_ref, w2_ref, b2_ref, fmax_ref, acc_ref):
    """Running max over N of pointfeat = conv2(relu(conv1(x))).

    fmax_ref: (1, 256, 1) f32 output (written only on the last N tile)
    acc_ref:  (256, 1)    f32 VMEM scratch accumulator
    """
    n = pl.program_id(1)
    pf = _conv12(x_ref, w1_ref, b1_ref, w2_ref, b2_ref)
    tile_max = jnp.max(pf, axis=-1, keepdims=True)                     # (256, 1)

    @pl.when(n == 0)
    def _():
        acc_ref[...] = tile_max

    @pl.when(n > 0)
    def _():
        acc_ref[...] = jnp.maximum(acc_ref[...], tile_max)

    @pl.when(n == pl.num_programs(1) - 1)
    def _():
        fmax_ref[0] = acc_ref[...]


def _pass2_kernel(x_ref, w1_ref, b1_ref, w2_ref, b2_ref, gb_ref,
                  w3a_ref, w4_ref, b4_ref, g_ref, acc_ref):
    """Recompute pointfeat, then conv3 (split) + relu + conv4, running max.

    gb_ref:  (1, 512, 1)  f32   precomputed  w3b @ fmax + b3
    w3a_ref: (512, 256)   bf16  acts on pointfeat
    w4_ref:  (1024, 512)  bf16  b4_ref: (1024, 1) f32
    g_ref:   (1, 1024, 1) f32 output (written only on the last N tile)
    acc_ref: (1024, 1)    f32 VMEM scratch accumulator
    """
    n = pl.program_id(1)
    pf = _conv12(x_ref, w1_ref, b1_ref, w2_ref, b2_ref)                # (256, Nt)

    h3 = jnp.dot(w3a_ref[...], pf.astype(jnp.bfloat16),
                 preferred_element_type=jnp.float32) + gb_ref[0]       # (512, Nt)
    h3 = jnp.maximum(h3, 0.0)
    h4 = jnp.dot(w4_ref[...], h3.astype(jnp.bfloat16),
                 preferred_element_type=jnp.float32) + b4_ref[...]     # (1024, Nt)

    tile_max = jnp.max(h4, axis=-1, keepdims=True)                     # (1024, 1)

    @pl.when(n == 0)
    def _():
        acc_ref[...] = tile_max

    @pl.when(n > 0)
    def _():
        acc_ref[...] = jnp.maximum(acc_ref[...], tile_max)

    @pl.when(n == pl.num_programs(1) - 1)
    def _():
        g_ref[0] = acc_ref[...]


def _pass3_kernel(x_ref, w1_ref, b1_ref, w2_ref, b2_ref, g_ref, out_ref):
    """Emit concat([global feat repeated, pointfeat]) per tile.

    Recomputes pointfeat from x (cheap, hidden under the 1280-row store)
    so pointfeat is never staged through HBM.

    g_ref:   (1, 1024, 1)  f32
    out_ref: (1, 1280, Nt) f32
    """
    pf = _conv12(x_ref, w1_ref, b1_ref, w2_ref, b2_ref)                # (256, Nt)
    nt = out_ref.shape[-1]
    out_ref[0, :1024, :] = jnp.broadcast_to(g_ref[0], (1024, nt))
    out_ref[0, 1024:, :] = pf


# ---------------------------------------------------------------------------
# Wrapper
# ---------------------------------------------------------------------------
def _pick_tile(n, target):
    """Largest multiple of 128 that divides n and is <= target; else full n."""
    t = (min(n, target) // 128) * 128
    while t >= 128:
        if n % t == 0:
            return t
        t -= 128
    return n  # fallback: single full-N tile (small / non-128-multiple N)


def _round_bf16(a):
    """Emulate MXU operand rounding without emitting a bf16 dot on the host."""
    return a.astype(jnp.bfloat16).astype(jnp.float32)


def pcn_encoder(x_bcn, params, global_feat=False,
                n_tile_p1=2048, n_tile_p2=1024, n_tile_p3=2048):
    """x_bcn: (B, C, N) float32, PyTorch NCW layout.  params: dict of weights."""
    B, C, N = x_bcn.shape
    x = x_bcn.astype(jnp.float32)

    nt1 = _pick_tile(N, n_tile_p1)
    nt2 = _pick_tile(N, n_tile_p2)
    nt3 = _pick_tile(N, n_tile_p3)

    # Weights transposed to (C_out, C_in); MXU operands pre-cast to bf16.
    w1t = params["w1"].T.astype(jnp.bfloat16)           # (128, C)
    w2t = params["w2"].T.astype(jnp.bfloat16)           # (256, 128)
    w3 = params["w3"]                                   # (512_in, 512_out)
    w3at = w3[:256, :].T.astype(jnp.bfloat16)           # (512, 256) acts on pf
    w3bt = w3[256:, :].T.astype(jnp.float32)            # (512, 256) acts on feat
    w4t = params["w4"].T.astype(jnp.bfloat16)           # (1024, 512)
    # Biases kept f32 as (C_out, 1) columns (broadcast over the lane axis).
    b1t = params["b1"].T.astype(jnp.float32)            # (128, 1)
    b2t = params["b2"].T.astype(jnp.float32)            # (256, 1)
    b3t = params["b3"].T.astype(jnp.float32)            # (512, 1)
    b4t = params["b4"].T.astype(jnp.float32)            # (1024, 1)

    cparams_red = pltpu.CompilerParams(
        dimension_semantics=("parallel", "arbitrary"),
        vmem_limit_bytes=_VMEM_LIMIT)

    weight_specs = [
        pl.BlockSpec((128, C), lambda b, n: (0, 0)),
        pl.BlockSpec((128, 1), lambda b, n: (0, 0)),
        pl.BlockSpec((256, 128), lambda b, n: (0, 0)),
        pl.BlockSpec((256, 1), lambda b, n: (0, 0)),
    ]

    # --- pass 1: running max of pointfeat (no pf staging) --------------------
    fmax = pl.pallas_call(
        _pass1_kernel,
        out_shape=jax.ShapeDtypeStruct((B, 256, 1), jnp.float32),
        grid_spec=pltpu.PrefetchScalarGridSpec(
            num_scalar_prefetch=0,
            grid=(B, N // nt1),
            in_specs=[pl.BlockSpec((1, C, nt1), lambda b, n: (b, 0, n))]
                     + weight_specs,
            out_specs=pl.BlockSpec((1, 256, 1), lambda b, n: (b, 0, 0)),
            scratch_shapes=[pltpu.VMEM((256, 1), jnp.float32)],
        ),
        compiler_params=cparams_red,
    )(x, w1t, b1t, w2t, b2t)

    # Hoisted out of the per-tile loop: gbias = w3[256:]^T @ fmax + b3,
    # one tiny f32 matvec per batch (operands bf16-rounded to match the MXU).
    gbias = jnp.einsum("oc,bcu->bou", _round_bf16(w3bt), _round_bf16(fmax),
                       preferred_element_type=jnp.float32) + b3t[None]  # (B,512,1)

    # --- pass 2: recompute pf, conv3 (split) + conv4, running max -> g -------
    g = pl.pallas_call(
        _pass2_kernel,
        out_shape=jax.ShapeDtypeStruct((B, 1024, 1), jnp.float32),
        grid_spec=pltpu.PrefetchScalarGridSpec(
            num_scalar_prefetch=0,
            grid=(B, N // nt2),
            in_specs=[pl.BlockSpec((1, C, nt2), lambda b, n: (b, 0, n))]
                     + weight_specs
                     + [
                pl.BlockSpec((1, 512, 1), lambda b, n: (b, 0, 0)),
                pl.BlockSpec((512, 256), lambda b, n: (0, 0)),
                pl.BlockSpec((1024, 512), lambda b, n: (0, 0)),
                pl.BlockSpec((1024, 1), lambda b, n: (0, 0)),
            ],
            out_specs=pl.BlockSpec((1, 1024, 1), lambda b, n: (b, 0, 0)),
            scratch_shapes=[pltpu.VMEM((1024, 1), jnp.float32)],
        ),
        compiler_params=cparams_red,
    )(x, w1t, b1t, w2t, b2t, gbias, w3at, w4t, b4t)

    if global_feat:
        # The (B, 1280, N) output is never materialized on this path.
        return g[:, :, 0]                               # (B, 1024)

    # --- pass 3: write [g repeated over N ; pointfeat] lane-dense ------------
    out = pl.pallas_call(
        _pass3_kernel,
        out_shape=jax.ShapeDtypeStruct((B, 1280, N), jnp.float32),
        grid_spec=pltpu.PrefetchScalarGridSpec(
            num_scalar_prefetch=0,
            grid=(B, N // nt3),
            in_specs=[pl.BlockSpec((1, C, nt3), lambda b, n: (b, 0, n))]
                     + weight_specs
                     + [pl.BlockSpec((1, 1024, 1), lambda b, n: (b, 0, 0))],
            out_specs=pl.BlockSpec((1, 1280, nt3), lambda b, n: (b, 0, n)),
        ),
        compiler_params=pltpu.CompilerParams(
            dimension_semantics=("parallel", "parallel"),
            vmem_limit_bytes=_VMEM_LIMIT),
    )(x, w1t, b1t, w2t, b2t, g)

    return out                                          # (B, 1280, N), NCW


# ---------------------------------------------------------------------------
# Reference (mirrors the PyTorch forward in NCW layout).  Matmul operands are
# rounded to bf16 and contracted in f32 to mirror the kernel's MXU numerics
# without emitting a bf16 x bf16 dot on the host backend.
# ---------------------------------------------------------------------------
def pcn_encoder_ref(x_bcn, params, global_feat=False):
    r = _round_bf16

    def conv(x, w, b):
        y = jnp.einsum("bcn,cd->bdn", r(x), r(w),
                       preferred_element_type=jnp.float32)
        return y + b[0][None, :, None]

    h1 = jax.nn.relu(conv(x_bcn, params["w1"], params["b1"]))
    pf = conv(h1, params["w2"], params["b2"])                       # (B, 256, N)
    feat = jnp.max(pf, axis=2, keepdims=True)
    cat = jnp.concatenate([pf, jnp.broadcast_to(feat, pf.shape)], axis=1)
    h3 = jax.nn.relu(conv(cat, params["w3"], params["b3"]))
    h4 = conv(h3, params["w4"], params["b4"])                       # (B, 1024, N)
    g = jnp.max(h4, axis=2)                                         # (B, 1024)
    if global_feat:
        return g
    B, _, N = x_bcn.shape
    return jnp.concatenate(
        [jnp.broadcast_to(g[:, :, None], (B, 1024, N)), pf], axis=1)


def init_params(key, channel=3):
    """Deterministic synthetic parameters.  Conv1d(k=1) weight (out,in,1) is
    stored transposed as (in, out); biases stored as (1, out)."""
    ks = jax.random.split(key, 8)
    mk = lambda k, ci, co: (jax.random.normal(k, (ci, co), jnp.float32)
                            * (1.0 / np.sqrt(ci)))
    bk = lambda k, co: jax.random.normal(k, (1, co), jnp.float32) * 0.01
    return {
        "w1": mk(ks[0], channel, 128), "b1": bk(ks[1], 128),
        "w2": mk(ks[2], 128, 256),     "b2": bk(ks[3], 256),
        "w3": mk(ks[4], 512, 512),     "b3": bk(ks[5], 512),
        "w4": mk(ks[6], 512, 1024),    "b4": bk(ks[7], 1024),
    }


if __name__ == "__main__":
    key = jax.random.PRNGKey(0)
    k_x, k_p = jax.random.split(key)

    # Small shapes; N=256 with 128-point tiles exercises the multi-tile
    # running-max (accumulator) path across the N grid axis in every pass.
    B, C, N = 2, 3, 256
    x = jax.random.normal(k_x, (B, C, N), jnp.float32)
    params = init_params(k_p, channel=C)

    # global_feat=False path (module default): output (B, 1280, N) in NCW.
    out = jax.block_until_ready(
        pcn_encoder(x, params, global_feat=False,
                    n_tile_p1=128, n_tile_p2=128, n_tile_p3=128))
    ref = jax.block_until_ready(
        pcn_encoder_ref(x, params, global_feat=False))
    assert out.shape == (B, 1280, N), out.shape
    np.testing.assert_allclose(np.asarray(out), np.asarray(ref),
                               rtol=5e-3, atol=5e-3)

    # global_feat=True path: output (B, 1024); no big output, no pf staging.
    g = jax.block_until_ready(
        pcn_encoder(x, params, global_feat=True,
                    n_tile_p1=128, n_tile_p2=128))
    g_ref = jax.block_until_ready(
        pcn_encoder_ref(x, params, global_feat=True))
    assert g.shape == (B, 1024), g.shape
    np.testing.assert_allclose(np.asarray(g), np.asarray(g_ref),
                               rtol=5e-3, atol=5e-3)

    print("KERNEL_OK")
</pallas_src>

<mosaic_0001>
module attributes {stable_mosaic.version = 11 : i64} {
  func.func @_pass1_kernel(%arg0: i32, %arg1: i32, %arg2: memref<1x3x128xf32, #tpu.memory_space<vmem>>, %arg3: memref<128x3xbf16, #tpu.memory_space<vmem>>, %arg4: memref<128x1xf32, #tpu.memory_space<vmem>>, %arg5: memref<256x128xbf16, #tpu.memory_space<vmem>>, %arg6: memref<256x1xf32, #tpu.memory_space<vmem>>, %arg7: memref<1x256x1xf32, #tpu.memory_space<vmem>>, %arg8: memref<256x1xf32, #tpu.memory_space<vmem>>) attributes {dimension_semantics = [#tpu.dimension_semantics<parallel>, #tpu.dimension_semantics<arbitrary>], iteration_bounds = array<i64: 2, 2>, scalar_prefetch = 0 : i64, scratch_operands = 1 : i64, tpu.core_type = #tpu.core_type<tc>, window_params = [{transform_indices = @transform_0, window_bounds = array<i64: 1, 3, 128>}, {pipeline_mode = #tpu.pipeline_mode<synchronous>, transform_indices = @transform_1, window_bounds = array<i64: 128, 3>}, {pipeline_mode = #tpu.pipeline_mode<synchronous>, transform_indices = @transform_2, window_bounds = array<i64: 128, 1>}, {pipeline_mode = #tpu.pipeline_mode<synchronous>, transform_indices = @transform_3, window_bounds = array<i64: 256, 128>}, {pipeline_mode = #tpu.pipeline_mode<synchronous>, transform_indices = @transform_4, window_bounds = array<i64: 256, 1>}, {transform_indices = @transform_5, window_bounds = array<i64: 1, 256, 1>}]} {
    %c0 = arith.constant 0 : index
    %c0_0 = arith.constant 0 : index
    %c0_1 = arith.constant 0 : index
    %0 = vector.load %arg2[%c0, %c0_0, %c0_1] : memref<1x3x128xf32, #tpu.memory_space<vmem>>, vector<1x3x128xf32>
    %1 = vector.shape_cast %0 : vector<1x3x128xf32> to vector<3x128xf32>
    %2 = arith.truncf %1 : vector<3x128xf32> to vector<3x128xbf16>
    %c0_2 = arith.constant 0 : index
    %c0_3 = arith.constant 0 : index
    %3 = vector.load %arg3[%c0_2, %c0_3] : memref<128x3xbf16, #tpu.memory_space<vmem>>, vector<128x3xbf16>
    %cst = arith.constant dense<0.000000e+00> : vector<128x128xf32>
    %4 = tpu.matmul %3, %2, %cst {dimension_numbers = #tpu.dot_dimension_numbers<[1], [0], [0], [1], [0, 0, 1, 1], [], []>} : vector<128x3xbf16>, vector<3x128xbf16>, vector<128x128xf32> -> vector<128x128xf32>
    %c0_4 = arith.constant 0 : index
    %c0_5 = arith.constant 0 : index
    %5 = vector.load %arg4[%c0_4, %c0_5] : memref<128x1xf32, #tpu.memory_space<vmem>>, vector<128x1xf32>
    %6 = vector.broadcast %5 : vector<128x1xf32> to vector<128x128xf32>
    %7 = arith.addf %4, %6 : vector<128x128xf32>
    %cst_6 = arith.constant 0.000000e+00 : f32
    %8 = vector.broadcast %cst_6 : f32 to vector<128x128xf32>
    %9 = arith.maximumf %7, %8 : vector<128x128xf32>
    %c0_7 = arith.constant 0 : index
    %c0_8 = arith.constant 0 : index
    %10 = vector.load %arg5[%c0_7, %c0_8] : memref<256x128xbf16, #tpu.memory_space<vmem>>, vector<256x128xbf16>
    %11 = arith.truncf %9 : vector<128x128xf32> to vector<128x128xbf16>
    %cst_9 = arith.constant dense<0.000000e+00> : vector<256x128xf32>
    %12 = tpu.matmul %10, %11, %cst_9 {dimension_numbers = #tpu.dot_dimension_numbers<[1], [0], [0], [1], [0, 0, 1, 1], [], []>} : vector<256x128xbf16>, vector<128x128xbf16>, vector<256x128xf32> -> vector<256x128xf32>
    %c0_10 = arith.constant 0 : index
    %c0_11 = arith.constant 0 : index
    %13 = vector.load %arg6[%c0_10, %c0_11] : memref<256x1xf32, #tpu.memory_space<vmem>>, vector<256x1xf32>
    %14 = vector.broadcast %13 : vector<256x1xf32> to vector<256x128xf32>
    %15 = arith.addf %12, %14 : vector<256x128xf32>
    %cst_12 = arith.constant dense<0xFF800000> : vector<256xf32>
    %16 = vector.multi_reduction <maximumf>, %15, %cst_12 [1] : vector<256x128xf32> to vector<256xf32>
    %17 = vector.shape_cast %16 : vector<256xf32> to vector<256x1xf32>
    %c0_i32 = arith.constant 0 : i32
    %18 = arith.cmpi eq, %arg1, %c0_i32 : i32
    %19 = arith.extui %18 : i1 to i32
    %c0_i32_13 = arith.constant 0 : i32
    %20 = arith.cmpi ne, %19, %c0_i32_13 : i32
    scf.if %20 {
      %c0_17 = arith.constant 0 : index
      %c0_18 = arith.constant 0 : index
      %27 = vector.load %arg8[%c0_17, %c0_18] : memref<256x1xf32, #tpu.memory_space<vmem>>, vector<256x1xf32>
      tpu.vector_store %arg8[%c0_17, %c0_18], %17 {strides = array<i32>} : memref<256x1xf32, #tpu.memory_space<vmem>>, vector<256x1xf32>,
    } else {
    }
    %c0_i32_14 = arith.constant 0 : i32
    %21 = arith.cmpi sgt, %arg1, %c0_i32_14 : i32
    %22 = arith.extui %21 : i1 to i32
    %c0_i32_15 = arith.constant 0 : i32
    %23 = arith.cmpi ne, %22, %c0_i32_15 : i32
    scf.if %23 {
      %c0_17 = arith.constant 0 : index
      %c0_18 = arith.constant 0 : index
      %27 = vector.load %arg8[%c0_17, %c0_18] : memref<256x1xf32, #tpu.memory_space<vmem>>, vector<256x1xf32>
      %28 = arith.maximumf %27, %17 : vector<256x1xf32>
      %c0_19 = arith.constant 0 : index
      %c0_20 = arith.constant 0 : index
      %29 = vector.load %arg8[%c0_19, %c0_20] : memref<256x1xf32, #tpu.memory_space<vmem>>, vector<256x1xf32>
      tpu.vector_store %arg8[%c0_19, %c0_20], %28 {strides = array<i32>} : memref<256x1xf32, #tpu.memory_space<vmem>>, vector<256x1xf32>,
    } else {
    }
    %c1_i32 = arith.constant 1 : i32
    %24 = arith.cmpi eq, %arg1, %c1_i32 : i32
    %25 = arith.extui %24 : i1 to i32
    %c0_i32_16 = arith.constant 0 : i32
    %26 = arith.cmpi ne, %25, %c0_i32_16 : i32
    scf.if %26 {
      %c0_17 = arith.constant 0 : index
      %c0_18 = arith.constant 0 : index
      %27 = vector.load %arg8[%c0_17, %c0_18] : memref<256x1xf32, #tpu.memory_space<vmem>>, vector<256x1xf32>
      %c0_19 = arith.constant 0 : index
      %c0_20 = arith.constant 0 : index
      %c0_21 = arith.constant 0 : index
      %28 = vector.load %arg7[%c0_19, %c0_20, %c0_21] : memref<1x256x1xf32, #tpu.memory_space<vmem>>, vector<1x256x1xf32>
      %29 = vector.shape_cast %28 : vector<1x256x1xf32> to vector<256x1xf32>
      %30 = vector.shape_cast %27 : vector<256x1xf32> to vector<1x256x1xf32>
      tpu.vector_store %arg7[%c0_19, %c0_20, %c0_21], %30 {strides = array<i32>} : memref<1x256x1xf32, #tpu.memory_space<vmem>>, vector<1x256x1xf32>,
    } else {
    }
    return
  }
  func.func @transform_0(%arg0: i32, %arg1: i32) -> (i32, i32, i32) {
    %c0_i32 = arith.constant 0 : i32
    %c0_i32_0 = arith.constant 0 : i32
    return %arg0, %c0_i32, %arg1 : i32, i32, i32
  }
  func.func @transform_1(%arg0: i32, %arg1: i32) -> (i32, i32) {
    %c0_i32 = arith.constant 0 : i32
    %c0_i32_0 = arith.constant 0 : i32
    %c0_i32_1 = arith.constant 0 : i32
    return %c0_i32, %c0_i32_0 : i32, i32
  }
  func.func @transform_2(%arg0: i32, %arg1: i32) -> (i32, i32) {
    %c0_i32 = arith.constant 0 : i32
    %c0_i32_0 = arith.constant 0 : i32
    %c0_i32_1 = arith.constant 0 : i32
    return %c0_i32, %c0_i32_0 : i32, i32
  }
  func.func @transform_3(%arg0: i32, %arg1: i32) -> (i32, i32) {
    %c0_i32 = arith.constant 0 : i32
    %c0_i32_0 = arith.constant 0 : i32
    %c0_i32_1 = arith.constant 0 : i32
    return %c0_i32, %c0_i32_0 : i32, i32
  }
  func.func @transform_4(%arg0: i32, %arg1: i32) -> (i32, i32) {
    %c0_i32 = arith.constant 0 : i32
    %c0_i32_0 = arith.constant 0 : i32
    %c0_i32_1 = arith.constant 0 : i32
    return %c0_i32, %c0_i32_0 : i32, i32
  }
  func.func @transform_5(%arg0: i32, %arg1: i32) -> (i32, i32, i32) {
    %c0_i32 = arith.constant 0 : i32
    %c0_i32_0 = arith.constant 0 : i32
    %c0_i32_1 = arith.constant 0 : i32
    return %arg0, %c0_i32, %c0_i32_0 : i32, i32, i32
  }
}

</mosaic_0001>

<bundles_post_ra>
// kernel: tpu_custom_call.1
= control target key start
LH: loop header
LB: loop body
LE: loop exit
PB: predicated region body
PF: predicated region fallthrough
CT: control target
= control target key end

     0   :  { %s1682_s18 = smov 0   ;;  %s1684_s19 = smov 0   ;;  %s2238_s0 = inlined_call_operand.vmem [shape: f32[2,3,256], index: 0, kind: input, shape index: {}]   ;;  %s2239_s1 = inlined_call_operand.vmem [shape: bf16[128,3], index: 1, kind: input, shape index: {}]   ;;  %s2240_s2 = inlined_call_operand.vmem [shape: f32[128,1], index: 2, kind: input, shape index: {}]   ;;  %s2241_s3 = inlined_call_operand.vmem [shape: bf16[256,128], index: 3, kind: input, shape index: {}]   ;;  %s2242_s4 = inlined_call_operand.vmem [shape: f32[256,1], index: 4, kind: input, shape index: {}]   ;;  %s2243_s5 = inlined_call_operand.vmem [shape: f32[2,256,1], index: 5, kind: output, shape index: {}]  }
   0x1   :  { %s1686_s20 = smov 0   ;;  %s1688_s21 = smov 0  }
   0x2   :  { %s1690_s22 = smov 0  }
   0x3 LB: > { %s24_s23 = sadd.s32 1, %s1640_s20  ;;  %s27_s24 = sadd.s32 1, %s1644_s21  ;;  %s1648_s22 = sphi %s1690_s22, %s15_s22   ;;  %s1644_s21 = sphi %s1688_s21, %s2247_s21   ;;  %s1640_s20 = sphi %s1686_s20, %s2246_s20   ;;  %s1636_s19 = sphi %s1684_s19, %s2245_s19   ;;  %s1632_s18 = sphi %s1682_s18, %s2244_s18  }
   0x4   : > { %p25_p0 = scmp.ge.s32.totalorder %s24_s23, 2  ;;  %p1384_p1 = scmp.ge.s32.totalorder %s1648_s22, 1 }
   0x5   : > { %p204_p2 = scmp.lt.s32.totalorder %s1648_s22, 5 }
   0x6   : > { %s2249_s23 = smov (%p25_p0, %s24_s23), 0  ;;  %s2251_s24 = smov (!%p25_p0, %s27_s24), %s1644_s21 }
   0x7   : > { %p205_p3 = pnand %p1384_p1, %p204_p2  ;;  %p29_p4 = scmp.ge.s32.totalorder %s2251_s24, 2 }
   0x8   : > { %v267_v0 = vld [vmem:[%s2240_s2] sm:$0xff] (!%p205_p3)  ;;  %v269_v1 = vld [vmem:[%s2240_s2 + $0x10] sm:$0xff] (!%p205_p3)  ;;  %p235_p5 = scmp.lt.s32.totalorder (!%p205_p3), %s1636_s19, 1  ;;  %p237_p6 = scmp.lt.s32.totalorder (!%p205_p3), %s1632_s18, 1  ;;  %v1650_v2 = vmov (!%p205_p3), 0   ;;  %vm428_vm0 = vcmask (!%p205_p3), 1040384  }
   0x9   : > { %s2253_s24 = smov (%p29_p4, %s2251_s24), 0  ;;  %208 = sbr.rel (%p205_p3) target bundleno = 743 (0x2e7), region = 40 }
   0xa   : > { %1584 = vset.pattern.permute.xlu0 (!%p205_p3), %v1650_v2  ;;  %1585 = vset.pattern.permute.xlu1 (!%p205_p3), %v1650_v2  ;;  %v1586_v3 = vld [vmem:[%s2239_s1] sm:$0xff] (!%p205_p3)   ;;  %v268_v4 = vld [vmem:[%s2240_s2 + $0x8] sm:$0xff] (!%p205_p3)  ;;  %v270_v5 = vld [vmem:[%s2240_s2 + $0x18] sm:$0xff] (!%p205_p3)  ;;  %vm403_vm1 = vcmask (!%p205_p3), 23552   ;;  %vm429_vm2 = vcmask (!%p205_p3), 1041408   ;;  %v1651_v6 = vmov (!%p205_p3), 65535  }
   0xb   : > { %285 = vperm.xlu0 (!%p205_p3), %1584, %v267_v0   ;;  %295 = vperm.xlu1 (!%p205_p3), %1585, %v269_v1   ;;  %v430_v7 = vsel (!%p205_p3), %vm428_vm0, 4294967295, %v1651_v6  ;;  %v271_v8 = vld [vmem:[%s2240_s2 + $0x20] sm:$0xff] (!%p205_p3)  ;;  %v272_v9 = vld [vmem:[%s2240_s2 + $0x28] sm:$0xff] (!%p205_p3)  ;;  %v273_v14 = vld [vmem:[%s2240_s2 + $0x30] sm:$0xff] (!%p205_p3)  ;;  %p1421_p7 = scmp.ne.s32.totalorder (!%p205_p3), %s1632_s18, 0 }
   0xc   : > { %1462 = vmatprep.mubr.msk.bf16.mxu0 (!%p205_p3), %vm403_vm1, %v1586_v3  ;;  %v431_v11 = vsel (!%p205_p3), %vm429_vm2, %v430_v7, 0  ;;  %v274_v15 = vld [vmem:[%s2240_s2 + $0x38] sm:$0xff] (!%p205_p3)  ;;  %v1587_v16 = vld [vmem:[%s2239_s1 + $0x8] sm:$0xff] (!%p205_p3)   ;;  %v1588_v17 = vld [vmem:[%s2239_s1 + $0x10] sm:$0xff] (!%p205_p3)  }
   0xd   : > { %v275_v18 = vld [vmem:[%s2240_s2 + $0x40] sm:$0xff] (!%p205_p3)  ;;  %v276_v19 = vld [vmem:[%s2240_s2 + $0x48] sm:$0xff] (!%p205_p3)  ;;  %v277_v20 = vld [vmem:[%s2240_s2 + $0x50] sm:$0xff] (!%p205_p3) }
   0xe   : > { %v278_v21 = vld [vmem:[%s2240_s2 + $0x58] sm:$0xff] (!%p205_p3)  ;;  %v1590_v23 = vld [vmem:[%s2239_s1 + $0x20] sm:$0xff] (!%p205_p3)   ;;  %v280_v25 = vld [vmem:[%s2240_s2 + $0x68] sm:$0xff] (!%p205_p3) }
   0xf   : > { %290 = vperm.xlu0 (!%p205_p3), %1584, %v268_v4   ;;  %300 = vperm.xlu1 (!%p205_p3), %1585, %v270_v5   ;;  %v1589_v22 = vld [vmem:[%s2239_s1 + $0x18] sm:$0xff] (!%p205_p3)   ;;  %v279_v24 = vld [vmem:[%s2240_s2 + $0x60] sm:$0xff] (!%p205_p3)  ;;  %v281_v26 = vld [vmem:[%s2240_s2 + $0x70] sm:$0xff] (!%p205_p3) }
  0x10   : > { %s2255_s19 = smov (!%p235_p5, %s1636_s19), 1  ;;  %v282_v27 = vld [vmem:[%s2240_s2 + $0x78] sm:$0xff]  ;;  %v1591_v28 = vld [vmem:[%s2239_s1 + $0x28] sm:$0xff]   ;;  %v1592_v29 = vld [vmem:[%s2239_s1 + $0x30] sm:$0xff]   ;;  %vm1105_vm3 = vcmask (!%p1421_p7), 7168  }
  0x11   : > { %s238_s8 = scalar_select %p237_p6, %s1632_s18, 1  ;;  %v588_v30 = vld [vmem:[%s2242_s4] sm:$0xff]  ;;  %v589_v31 = vld [vmem:[%s2242_s4 + $0x8] sm:$0xff]  ;;  %v590_v32 = vld [vmem:[%s2242_s4 + $0x10] sm:$0xff] }
  0x12   : > { %s1385_s11 = sshll.u32 %s2255_s19, 1  ;;  %s1426_s12 = sshll.u32 %s2255_s19, 8  ;;  %v591_v33 = vld [vmem:[%s2242_s4 + $0x18] sm:$0xff]  ;;  %v592_v35 = vld [vmem:[%s2242_s4 + $0x20] sm:$0xff]  ;;  %v593_v36 = vld [vmem:[%s2242_s4 + $0x28] sm:$0xff] }
  0x13   : > { %s240_s13 = sadd.s32 %s1385_s11, %s238_s8  ;;  %s1735_s16 = scalar_lea.vmem %s2243_s5, %s1426_s12  ;;  %305 = vperm.xlu0 %1584, %v271_v8   ;;  %310 = vperm.xlu1 %1585, %v272_v9   ;;  %v1593_v34 = vld [vmem:[%s2239_s1 + $0x38] sm:$0xff]   ;;  %v594_v37 = vld [vmem:[%s2242_s4 + $0x30] sm:$0xff]  ;;  %v596_v39 = vld [vmem:[%s2242_s4 + $0x40] sm:$0xff] }
  0x14   : > { %s1386_s17 = sshll.u32 %s240_s13, 2  ;;  %v595_v38 = vld [vmem:[%s2242_s4 + $0x38] sm:$0xff]  ;;  %v597_v40 = vld [vmem:[%s2242_s4 + $0x48] sm:$0xff]  ;;  %v598_v41 = vld [vmem:[%s2242_s4 + $0x50] sm:$0xff] }
  0x15   : > { %s242_s27 = scalar_lea.vmem %s2238_s0, %s1386_s17  ;;  %v599_v42 = vld [vmem:[%s2242_s4 + $0x58] sm:$0xff]  ;;  %v600_v43 = vld [vmem:[%s2242_s4 + $0x60] sm:$0xff]  ;;  %v601_v44 = vld [vmem:[%s2242_s4 + $0x68] sm:$0xff] }
  0x16   : > { %v249_v10 = vld [vmem:[%s242_s27] sm:$0x7]  ;;  %v602_v45 = vld [vmem:[%s2242_s4 + $0x70] sm:$0xff]  ;;  %v603_v46 = vld [vmem:[%s2242_s4 + $0x78] sm:$0xff] }
  0x17   : > { %v250_v12 = vpack.c.bf16 %v249_v10, %v249_v10  ;;  %315 = vperm.xlu0 %1584, %v273_v14   ;;  %320 = vperm.xlu1 %1585, %v274_v15   ;;  %v604_v47 = vld [vmem:[%s2242_s4 + $0x80] sm:$0xff]  ;;  %v605_v48 = vld [vmem:[%s2242_s4 + $0x88] sm:$0xff]  ;;  %v606_v49 = vld [vmem:[%s2242_s4 + $0x90] sm:$0xff] }
  0x18   : > { %v607_v50 = vld [vmem:[%s2242_s4 + $0x98] sm:$0xff]  ;;  %v608_v51 = vld [vmem:[%s2242_s4 + $0xa0] sm:$0xff]  ;;  %v609_v52 = vld [vmem:[%s2242_s4 + $0xa8] sm:$0xff] }
  0x19   : > { %v433_v13 = vand.u32 %v431_v11, %v250_v12  ;;  %v610_v53 = vld [vmem:[%s2242_s4 + $0xb0] sm:$0xff]  ;;  %v611_v54 = vld [vmem:[%s2242_s4 + $0xb8] sm:$0xff]  ;;  %v612_v55 = vld [vmem:[%s2242_s4 + $0xc0] sm:$0xff] }
  0x1a   : > { %v613_v56 = vld [vmem:[%s2242_s4 + $0xc8] sm:$0xff]  ;;  %v614_v57 = vld [vmem:[%s2242_s4 + $0xd0] sm:$0xff]  ;;  %v615_v58 = vld [vmem:[%s2242_s4 + $0xd8] sm:$0xff] }
  0x1b   : > { %1460 = vmatprep.subr.bf16.mxu0 %v433_v13  ;;  %325 = vperm.xlu0 %1584, %v275_v18   ;;  %v616_v59 = vld [vmem:[%s2242_s4 + $0xe0] sm:$0xff]  ;;  %v617_v60 = vld [vmem:[%s2242_s4 + $0xe8] sm:$0xff]  ;;  %v618_v61 = vld [vmem:[%s2242_s4 + $0xf0] sm:$0xff] }
  0x1c   : > { %1461 = vmatpush3.bf16.msra.mxu0 %v433_v13  ;;  %330 = vperm.xlu1 %1585, %v276_v19   ;;  %v619_v62 = vld [vmem:[%s2242_s4 + $0xf8] sm:$0xff]  ;;  %v1594_v63 = vld [vmem:[%s2241_s3] sm:$0xff]   ;;  %v1595_v0 = vld [vmem:[%s2241_s3 + $0x30] sm:$0xff]  }
  0x1d   : > { %1506 = vmatprep.mubr.bf16.mxu1 %v1595_v0 }
  0x1f   : > { %1463 = vmatmul.mubr.msk.bf16.vlgmr.msra.gmra.mrb[0].mxu0 %vm403_vm1, %v1587_v16  ;;  %335 = vperm.xlu0 %1584, %v277_v20  }
  0x20   : > { %1466 = vmatprep.mubr.msk.bf16.mxu0 %vm403_vm1, %v1588_v17  ;;  %340 = vperm.xlu1 %1585, %v278_v21  }
  0x23   : > { %345 = vperm.xlu0 %1584, %v279_v24  }
  0x24   : > { %350 = vperm.xlu1 %1585, %v280_v25  }
  0x27   : > { %1467 = vmatmul.mubr.msk.bf16.gmra.mrb[4].mxu0 %vm403_vm1, %v1589_v22  ;;  %355 = vperm.xlu0 %1584, %v281_v26  }
  0x28   : > { %1470 = vmatprep.mubr.msk.bf16.mxu0 %vm403_vm1, %v1590_v23  ;;  %360 = vperm.xlu1 %1585, %v282_v27  }
  0x2b   : > { %622 = vperm.xlu0 %1584, %v588_v30  }
  0x2c   : > { %627 = vperm.xlu1 %1585, %v589_v31  }
  0x2f   : > { %1471 = vmatmul.mubr.msk.bf16.gmra.mrb[8].mxu0 %vm403_vm1, %v1591_v28  ;;  %632 = vperm.xlu0 %1584, %v590_v32  }
  0x30   : > { %1474 = vmatprep.mubr.msk.bf16.mxu0 %vm403_vm1, %v1592_v29  ;;  %637 = vperm.xlu1 %1585, %v591_v33  }
  0x33   : > { %642 = vperm.xlu0 %1584, %v592_v35  }
  0x34   : > { %647 = vperm.xlu1 %1585, %v593_v36  }
  0x37   : > { %1475 = vmatmul.mubr.msk.bf16.gmra.mrb[12].mxu0 %vm403_vm1, %v1593_v34  ;;  %652 = vperm.xlu0 %1584, %v594_v37  }
  0x38   : > { %657 = vperm.xlu1 %1585, %v595_v38   ;;  %1494 = vmatprep.mubr.bf16.mxu0 %v1594_v63 }
  0x3b   : > { %662 = vperm.xlu0 %1584, %v596_v39  }
  0x3c   : > { %667 = vperm.xlu1 %1585, %v597_v40  }
  0x3f   : > { %672 = vperm.xlu0 %1584, %v598_v41  }
  0x40   : > { %677 = vperm.xlu1 %1585, %v599_v42  }
  0x43   : > { %682 = vperm.xlu0 %1584, %v600_v43  }
  0x44   : > { %687 = vperm.xlu1 %1585, %v601_v44  }
  0x47   : > { %692 = vperm.xlu0 %1584, %v602_v45  }
  0x48   : > { %697 = vperm.xlu1 %1585, %v603_v46  }
  0x4b   : > { %702 = vperm.xlu0 %1584, %v604_v47  }
  0x4c   : > { %707 = vperm.xlu1 %1585, %v605_v48  }
  0x4f   : > { %712 = vperm.xlu0 %1584, %v606_v49  }
  0x50   : > { %717 = vperm.xlu1 %1585, %v607_v50  }
  0x53   : > { %722 = vperm.xlu0 %1584, %v608_v51  }
  0x54   : > { %727 = vperm.xlu1 %1585, %v609_v52  }
  0x57   : > { %732 = vperm.xlu0 %1584, %v610_v53  }
  0x58   : > { %737 = vperm.xlu1 %1585, %v611_v54  }
  0x5b   : > { %742 = vperm.xlu0 %1584, %v612_v55  }
  0x5c   : > { %747 = vperm.xlu1 %1585, %v613_v56  }
  0x5f   : > { %752 = vperm.xlu0 %1584, %v614_v57  }
  0x60   : > { %757 = vperm.xlu1 %1585, %v615_v58  }
  0x63   : > { %762 = vperm.xlu0 %1584, %v616_v59  }
  0x64   : > { %767 = vperm.xlu1 %1585, %v617_v60  }
  0x67   : > { %772 = vperm.xlu0 %1584, %v618_v61  }
  0x68   : > { %777 = vperm.xlu1 %1585, %v619_v62  }
  0x8a   : > { %v286_v1 = vpop.permute.xlu0 %285  ;;  %v296_v2 = vpop.permute.xlu1 %295 }
  0x8e   : > { %v291_v3 = vpop.permute.xlu0 %290  ;;  %v301_v4 = vpop.permute.xlu1 %300 }
  0x92   : > { %v306_v5 = vpop.permute.xlu0 %305  ;;  %v311_v6 = vpop.permute.xlu1 %310 }
  0x96   : > { %v316_v7 = vpop.permute.xlu0 %315  ;;  %v321_v11 = vpop.permute.xlu1 %320 }
  0x9a   : > { %v326_v19 = vpop.permute.xlu0 %325 }
  0x9b   : > { %v331_v23 = vpop.permute.xlu1 %330 }
  0x9e   : > { %v336_v32 = vpop.permute.xlu0 %335 }
  0x9f   : > { %v341_v36 = vpop.permute.xlu1 %340 }
  0xa2   : > { %v346_v44 = vpop.permute.xlu0 %345 }
  0xa3   : > { %v351_v49 = vpop.permute.xlu1 %350 }
  0xa6   : > { %v356_v56 = vpop.permute.xlu0 %355 }
  0xa7   : > { %v361_v61 = vpop.permute.xlu1 %360 }
  0xf2   : > { %v1464_v8 = vpop.f32.mrb[0].mxu0 }
  0xf3   : > { %v478_v9 = vadd.f32 %v1464_v8, %v296_v2  ;;  %v469_v10 = vpop.f32.mrb[1].mxu0 }
  0xf4   : > { %v470_v12 = vadd.f32 %v469_v10, %v286_v1  ;;  %v1465_v13 = vpop.f32.mrb[2].mxu0  ;;  %v1597_v10 = vld [vmem:[%s2241_s3 + $0x38] sm:$0xff]  }
  0xf5   : > { %v481_v14 = vadd.f32 %v1465_v13, %v301_v4  ;;  %v472_v15 = vpop.f32.mrb[3].mxu0  ;;  %v534_v17 = vmax.f32 %v478_v9, 0.0  ;;  %v1596_v9 = vld [vmem:[%s2241_s3 + $0x8] sm:$0xff]   ;;  %v1600_v13 = vld [vmem:[%s2241_s3 + $0x18] sm:$0xff]  }
  0xf6   : > { %v473_v16 = vadd.f32 %v472_v15, %v291_v3  ;;  %v532_v20 = vmax.f32 %v470_v12, 0.0  ;;  %v1599_v12 = vld [vmem:[%s2241_s3 + $0x40] sm:$0xff]  }
  0xf7   : > { %v535_v18 = vmax.f32 %v481_v14, 0.0  ;;  %v1601_v14 = vld [vmem:[%s2241_s3 + $0x48] sm:$0xff]   ;;  %v1602_v15 = vld [vmem:[%s2241_s3 + $0x20] sm:$0xff]  }
  0xf8   : > { %v533_v21 = vmax.f32 %v473_v16, 0.0  ;;  %v1603_v16 = vld [vmem:[%s2241_s3 + $0x50] sm:$0xff]  }
  0xf9   : > { %v581_v22 = vpack.c.bf16 %v535_v18, %v534_v17  ;;  %v1604_v17 = vld [vmem:[%s2241_s3 + $0x28] sm:$0xff]   ;;  %v1605_v18 = vld [vmem:[%s2241_s3 + $0x58] sm:$0xff]  }
  0xfa   : > { %v580_v24 = vpack.c.bf16 %v533_v21, %v532_v20  ;;  %v1468_v25 = vpop.f32.mrb[4].mxu0  ;;  %v1607_v20 = vld [vmem:[%s2241_s3 + $0x68] sm:$0xff]   ;;  %v1608_v21 = vld [vmem:[%s2241_s3 + $0x70] sm:$0xff]  }
  0xfb   : > { %v494_v26 = vadd.f32 %v1468_v25, %v316_v7  ;;  %v485_v27 = vpop.f32.mrb[5].mxu0 }
  0xfc   : > { %v486_v28 = vadd.f32 %v485_v27, %v306_v5  ;;  %v1469_v29 = vpop.f32.mrb[6].mxu0  ;;  %1478 = vmatprep.subr.bf16.mxu0 %v580_v24  ;;  %1526 = vmatprep.subr.bf16.mxu1 %v580_v24 }
  0xfd   : > { %v497_v30 = vadd.f32 %v1469_v29, %v321_v11  ;;  %v488_v31 = vpop.f32.mrb[7].mxu0  ;;  %1479 = vmatpush3.bf16.msra.mxu0 %v580_v24  ;;  %1534 = vmatpush3.bf16.msra.mxu1 %v580_v24  ;;  %v538_v34 = vmax.f32 %v494_v26, 0.0  ;;  %v1598_v11 = vld [vmem:[%s2241_s3 + $0x10] sm:$0xff]   ;;  %v628_v24 = vpop.permute.xlu1 %627 }
  0xfe   : > { %v489_v33 = vadd.f32 %v488_v31, %v311_v6  ;;  %1480 = vmatprep.subr.bf16.mxu0 %v581_v22  ;;  %1527 = vmatprep.subr.bf16.mxu1 %v581_v22  ;;  %v536_v37 = vmax.f32 %v486_v28, 0.0 }
  0xff   : > { %v539_v35 = vmax.f32 %v497_v30, 0.0 }
 0x100   : > { %v537_v38 = vmax.f32 %v489_v33, 0.0 }
 0x101   : > { %v583_v39 = vpack.c.bf16 %v539_v35, %v538_v34  ;;  %1481 = vmatpush3.bf16.msra.mxu0 %v581_v22  ;;  %1535 = vmatpush3.bf16.msra.mxu1 %v581_v22  ;;  %v1609_v22 = vld [vmem:[%s2241_s3 + $0x78] sm:$0xff]   ;;  %v638_v26 = vpop.permute.xlu1 %637 }
 0x102   : > { %v582_v40 = vpack.c.bf16 %v537_v38, %v536_v37  ;;  %v1472_v41 = vpop.f32.mrb[8].mxu0 }
 0x103   : > { %v510_v42 = vadd.f32 %v1472_v41, %v336_v32  ;;  %v501_v43 = vpop.f32.mrb[9].mxu0 }
 0x104   : > { %v502_v45 = vadd.f32 %v501_v43, %v326_v19  ;;  %v1473_v46 = vpop.f32.mrb[10].mxu0  ;;  %1482 = vmatprep.subr.bf16.mxu0 %v582_v40  ;;  %1528 = vmatprep.subr.bf16.mxu1 %v582_v40  ;;  %v1606_v19 = vld [vmem:[%s2241_s3 + $0x60] sm:$0xff]  }
 0x105   : > { %v513_v47 = vadd.f32 %v1473_v46, %v341_v36  ;;  %v504_v48 = vpop.f32.mrb[11].mxu0  ;;  %1483 = vmatpush3.bf16.msra.mxu0 %v582_v40  ;;  %1536 = vmatpush3.bf16.msra.mxu1 %v582_v40  ;;  %v542_v51 = vmax.f32 %v510_v42, 0.0  ;;  %v1949_v28 = vpop.permute.xlu1 %647 }
 0x106   : > { %v505_v50 = vadd.f32 %v504_v48, %v331_v23  ;;  %1484 = vmatprep.subr.bf16.mxu0 %v583_v39  ;;  %1529 = vmatprep.subr.bf16.mxu1 %v583_v39  ;;  %v540_v53 = vmax.f32 %v502_v45, 0.0  ;;  %v623_v23 = vpop.permute.xlu0 %622 }
 0x107   : > { %v543_v52 = vmax.f32 %v513_v47, 0.0 }
 0x108   : > { %v541_v54 = vmax.f32 %v505_v50, 0.0 }
 0x109   : > { %v585_v55 = vpack.c.bf16 %v543_v52, %v542_v51  ;;  %1485 = vmatpush3.bf16.msra.mxu0 %v583_v39  ;;  %1537 = vmatpush3.bf16.msra.mxu1 %v583_v39  ;;  %v658_v30 = vpop.permute.xlu1 %657 }
 0x10a   : > { %v584_v57 = vpack.c.bf16 %v541_v54, %v540_v53  ;;  %v1476_v58 = vpop.f32.mrb[12].mxu0  ;;  %v633_v25 = vpop.permute.xlu0 %632 }
 0x10b   : > { %v526_v59 = vadd.f32 %v1476_v58, %v356_v56  ;;  %v517_v60 = vpop.f32.mrb[13].mxu0 }
 0x10c   : > { %v518_v62 = vadd.f32 %v517_v60, %v346_v44  ;;  %v1477_v63 = vpop.f32.mrb[14].mxu0  ;;  %1486 = vmatprep.subr.bf16.mxu0 %v584_v57  ;;  %1530 = vmatprep.subr.bf16.mxu1 %v584_v57 }
 0x10d   : > { %v529_v0 = vadd.f32 %v1477_v63, %v361_v61  ;;  %v520_v1 = vpop.f32.mrb[15].mxu0  ;;  %1487 = vmatpush3.bf16.msra.mxu0 %v584_v57  ;;  %1538 = vmatpush3.bf16.msra.mxu1 %v584_v57  ;;  %v546_v3 = vmax.f32 %v526_v59, 0.0  ;;  %v1953_v32 = vpop.permute.xlu1 %667 }
 0x10e   : > { %v521_v2 = vadd.f32 %v520_v1, %v351_v49  ;;  %1488 = vmatprep.subr.bf16.mxu0 %v585_v55  ;;  %1531 = vmatprep.subr.bf16.mxu1 %v585_v55  ;;  %v544_v5 = vmax.f32 %v518_v62, 0.0  ;;  %v643_v27 = vpop.permute.xlu0 %642 }
 0x10f   : > { %v547_v4 = vmax.f32 %v529_v0, 0.0 }
 0x110   : > { %v545_v6 = vmax.f32 %v521_v2, 0.0 }
 0x111   : > { %v587_v7 = vpack.c.bf16 %v547_v4, %v546_v3  ;;  %1489 = vmatpush3.bf16.msra.mxu0 %v585_v55  ;;  %1539 = vmatpush3.bf16.msra.mxu1 %v585_v55  ;;  %v1957_v34 = vpop.permute.xlu1 %677 }
 0x112   : > { %v586_v8 = vpack.c.bf16 %v545_v6, %v544_v5  ;;  %v653_v29 = vpop.permute.xlu0 %652 }
 0x114   : > { %1490 = vmatprep.subr.bf16.mxu0 %v586_v8  ;;  %1532 = vmatprep.subr.bf16.mxu1 %v586_v8 }
 0x115   : > { %1491 = vmatpush3.bf16.msra.mxu0 %v586_v8  ;;  %1540 = vmatpush3.bf16.msra.mxu1 %v586_v8  ;;  %v688_v36 = vpop.permute.xlu1 %687 }
 0x116   : > { %1492 = vmatprep.subr.bf16.mxu0 %v587_v7  ;;  %1533 = vmatprep.subr.bf16.mxu1 %v587_v7  ;;  %v1951_v31 = vpop.permute.xlu0 %662 }
 0x119   : > { %1493 = vmatpush3.bf16.msra.mxu0 %v587_v7  ;;  %1541 = vmatpush3.bf16.msra.mxu1 %v587_v7  ;;  %v698_v50 = vpop.permute.xlu1 %697 }
 0x11a   : > { %v1955_v33 = vpop.permute.xlu0 %672 }
 0x11c   : > { %1495 = vmatmul.mubr.bf16.vlgmr.msra.gmra.mrb[16].mxu0 %v1596_v9  ;;  %1507 = vmatmul.mubr.bf16.vlgmr.msra.gmra.mrb[0].mxu1 %v1597_v10 }
 0x11d   : > { %1498 = vmatprep.mubr.bf16.mxu0 %v1598_v11  ;;  %1510 = vmatprep.mubr.bf16.mxu1 %v1599_v12  ;;  %v708_v0 = vpop.permute.xlu1 %707 }
 0x11e   : > { %v683_v35 = vpop.permute.xlu0 %682 }
 0x122   : > { %v693_v37 = vpop.permute.xlu0 %692 }
 0x124   : > { %1499 = vmatmul.mubr.bf16.gmra.mrb[20].mxu0 %v1600_v13  ;;  %1511 = vmatmul.mubr.bf16.gmra.mrb[4].mxu1 %v1601_v14  ;;  %v718_v14 = vpop.permute.xlu1 %717 }
 0x125   : > { %1502 = vmatprep.mubr.bf16.mxu0 %v1602_v15  ;;  %1514 = vmatprep.mubr.bf16.mxu1 %v1603_v16 }
 0x126   : > { %v703_v51 = vpop.permute.xlu0 %702 }
 0x12a   : > { %v713_v1 = vpop.permute.xlu0 %712 }
 0x12c   : > { %1503 = vmatmul.mubr.bf16.gmra.mrb[24].mxu0 %v1604_v17  ;;  %1515 = vmatmul.mubr.bf16.gmra.mrb[8].mxu1 %v1605_v18 }
 0x12d   : > { %1518 = vmatprep.mubr.bf16.mxu1 %v1606_v19 }
 0x12e   : > { %v723_v19 = vpop.permute.xlu0 %722 }
 0x134   : > { %1519 = vmatmul.mubr.bf16.gmra.mrb[12].mxu1 %v1607_v20 }
 0x135   : > { %1522 = vmatprep.mubr.bf16.mxu1 %v1608_v21 }
 0x13c   : > { %1523 = vmatmul.mubr.bf16.gmra.mrb[16].mxu1 %v1609_v22 }
 0x1ef   : > { %v1496_v38 = vpop.f32.mrb[16].mxu0  ;;  %v1508_v39 = vpop.f32.mrb[0].mxu1 }
 0x1f0   : > { %v919_v40 = vadd.f32 %v1496_v38, %v633_v25  ;;  %v967_v41 = vadd.f32 %v1508_v39, %v693_v37  ;;  %v910_v42 = vpop.f32.mrb[17].mxu0  ;;  %v958_v43 = vpop.f32.mrb[1].mxu1 }
 0x1f1   : > { %v1497_v44 = vpop.f32.mrb[18].mxu0  ;;  %v1509_v45 = vpop.f32.mrb[2].mxu1  ;;  %v911_v48 = vadd.f32 %v910_v42, %v623_v23  ;;  %v959_v49 = vadd.f32 %v958_v43, %v683_v35 }
 0x1f2   : > { %1065 = vmax.xlane.f32.xlu1 %v967_v41  ;;  %v961_v46 = vpop.f32.mrb[3].mxu1  ;;  %1041 = vmax.xlane.f32.xlu0 %v919_v40  ;;  %v913_v47 = vpop.f32.mrb[19].mxu0  ;;  %v922_v54 = vadd.f32 %v1497_v44, %v638_v26  ;;  %v970_v62 = vadd.f32 %v1509_v45, %v698_v50 }
 0x1f3   : > { %v914_v55 = vadd.f32 %v913_v47, %v628_v24  ;;  %v962_v4 = vadd.f32 %v961_v46, %v688_v36  ;;  %v733_v24 = vpop.permute.xlu0 %732 }
 0x1f6   : > { %1061 = vmax.xlane.f32.xlu1 %v959_v49  ;;  %1037 = vmax.xlane.f32.xlu0 %v911_v48 }
 0x1f7   : > { %v1500_v52 = vpop.f32.mrb[20].mxu0  ;;  %v1512_v53 = vpop.f32.mrb[4].mxu1 }
 0x1f8   : > { %v926_v56 = vpop.f32.mrb[21].mxu0  ;;  %v974_v57 = vpop.f32.mrb[5].mxu1  ;;  %v935_v63 = vadd.f32 %v1500_v52, %v653_v29  ;;  %v983_v5 = vadd.f32 %v1512_v53, %v713_v1 }
 0x1f9   : > { %v1501_v58 = vpop.f32.mrb[22].mxu0  ;;  %v1513_v59 = vpop.f32.mrb[6].mxu1  ;;  %v927_v12 = vadd.f32 %v926_v56, %v643_v27  ;;  %v975_v16 = vadd.f32 %v974_v57, %v703_v51 }
 0x1fa   : > { %v929_v60 = vpop.f32.mrb[23].mxu0  ;;  %v977_v61 = vpop.f32.mrb[7].mxu1  ;;  %1039 = vmax.xlane.f32.xlu1 %v914_v55  ;;  %1043 = vmax.xlane.f32.xlu0 %v922_v54  ;;  %v938_v13 = vadd.f32 %v1501_v58, %v658_v30  ;;  %v986_v17 = vadd.f32 %v1513_v59, %v718_v14 }
 0x1fb   : > { %v930_v22 = vadd.f32 %v929_v60, %v1949_v28  ;;  %v978_v26 = vadd.f32 %v977_v61, %v708_v0  ;;  %v728_v30 = vpop.permute.xlu1 %727  ;;  %v743_v39 = vpop.permute.xlu0 %742 }
 0x1fe   : > { %1049 = vmax.xlane.f32.xlu1 %v935_v63  ;;  %1067 = vmax.xlane.f32.xlu0 %v970_v62 }
 0x1ff   : > { %v1504_v2 = vpop.f32.mrb[24].mxu0  ;;  %v1516_v3 = vpop.f32.mrb[8].mxu1 }
 0x200   : > { %v942_v6 = vpop.f32.mrb[25].mxu0  ;;  %v990_v7 = vpop.f32.mrb[9].mxu1  ;;  %v951_v23 = vadd.f32 %v1504_v2, %v1955_v33  ;;  %v999_v27 = vadd.f32 %v1516_v3, %v733_v24 }
 0x201   : > { %v1505_v8 = vpop.f32.mrb[26].mxu0  ;;  %v1517_v9 = vpop.f32.mrb[10].mxu1  ;;  %v943_v37 = vadd.f32 %v942_v6, %v1951_v31  ;;  %v991_v33 = vadd.f32 %v990_v7, %v723_v19 }
 0x202   : > { %v945_v10 = vpop.f32.mrb[27].mxu0  ;;  %v993_v11 = vpop.f32.mrb[11].mxu1  ;;  %1073 = vmax.xlane.f32.xlu1 %v983_v5  ;;  %1063 = vmax.xlane.f32.xlu0 %v962_v4  ;;  %v954_v38 = vadd.f32 %v1505_v8, %v1957_v34 }
 0x203   : > { %v738_v28 = vpop.permute.xlu1 %737  ;;  %v753_v41 = vpop.permute.xlu0 %752  ;;  %v946_v42 = vadd.f32 %v945_v10, %v1953_v32  ;;  %v994_v45 = vadd.f32 %v993_v11, %v728_v30 }
 0x204   : > { %v1002_v40 = vadd.f32 %v1517_v9, %v738_v28 }
 0x206   : > { %1045 = vmax.xlane.f32.xlu1 %v927_v12  ;;  %1051 = vmax.xlane.f32.xlu0 %v938_v13 }
 0x207   : > { %v1520_v15 = vpop.f32.mrb[12].mxu1  ;;  %v748_v44 = vpop.permute.xlu1 %747 }
 0x208   : > { %v1006_v18 = vpop.f32.mrb[13].mxu1  ;;  %v1015_v43 = vadd.f32 %v1520_v15, %v753_v41  ;;  %v763_v31 = vpop.permute.xlu0 %762 }
 0x209   : > { %v1521_v20 = vpop.f32.mrb[14].mxu1  ;;  %v1007_v46 = vadd.f32 %v1006_v18, %v743_v39 }
 0x20a   : > { %v1009_v21 = vpop.f32.mrb[15].mxu1  ;;  %1069 = vmax.xlane.f32.xlu1 %v975_v16  ;;  %1075 = vmax.xlane.f32.xlu0 %v986_v17 }
 0x20b   : > { %v758_v34 = vpop.permute.xlu1 %757  ;;  %v1010_v50 = vadd.f32 %v1009_v21, %v748_v44 }
 0x20c   : > { %v1018_v47 = vadd.f32 %v1521_v20, %v758_v34  ;;  %v773_v49 = vpop.permute.xlu0 %772 }
 0x20e   : > { %1057 = vmax.xlane.f32.xlu1 %v951_v23  ;;  %1047 = vmax.xlane.f32.xlu0 %v930_v22 }
 0x20f   : > { %v1524_v25 = vpop.f32.mrb[16].mxu1  ;;  %v768_v52 = vpop.permute.xlu1 %767 }
 0x210   : > { %v1022_v29 = vpop.f32.mrb[17].mxu1  ;;  %v1031_v51 = vadd.f32 %v1524_v25, %v773_v49 }
 0x211   : > { %v1525_v35 = vpop.f32.mrb[18].mxu1  ;;  %v1023_v48 = vadd.f32 %v1022_v29, %v763_v31 }
 0x212   : > { %v1025_v36 = vpop.f32.mrb[19].mxu1  ;;  %1081 = vmax.xlane.f32.xlu1 %v999_v27  ;;  %1071 = vmax.xlane.f32.xlu0 %v978_v26 }
 0x213   : > { %v1026_v32 = vadd.f32 %v1025_v36, %v768_v52  ;;  %v778_v53 = vpop.permute.xlu1 %777 }
 0x214   : > { %v1034_v54 = vadd.f32 %v1525_v35, %v778_v53 }
 0x216   : > { %1053 = vmax.xlane.f32.xlu1 %v943_v37  ;;  %1059 = vmax.xlane.f32.xlu0 %v954_v38 }
 0x21a   : > { %1077 = vmax.xlane.f32.xlu1 %v991_v33  ;;  %1083 = vmax.xlane.f32.xlu0 %v1002_v40 }
 0x21e   : > { %1089 = vmax.xlane.f32.xlu1 %v1015_v43  ;;  %1055 = vmax.xlane.f32.xlu0 %v946_v42 }
 0x222   : > { %1085 = vmax.xlane.f32.xlu1 %v1007_v46  ;;  %1079 = vmax.xlane.f32.xlu0 %v994_v45 }
 0x226   : > { %1093 = vmax.xlane.f32.xlu1 %v1023_v48  ;;  %1091 = vmax.xlane.f32.xlu0 %v1018_v47 }
 0x22a   : > { %1097 = vmax.xlane.f32.xlu1 %v1031_v51  ;;  %1087 = vmax.xlane.f32.xlu0 %v1010_v50 }
 0x22e   : > { %1095 = vmax.xlane.f32.xlu0 %v1026_v32 }
 0x232   : > { %1099 = vmax.xlane.f32.xlu0 %v1034_v54 }
 0x27f   : > { %v1964_v55 = vpop.xlane.xlu1 %1065  ;;  %v1966_v56 = vpop.xlane.xlu0 %1041 }
 0x280   : > { %1108 = vst.msk [vmem:[#allocation2 + $0x10] sm:$0xff] (!%p1421_p7), %vm1105_vm3, %v1966_v56  ;;  %1120 = vst.msk [vmem:[#allocation2 + $0x70] sm:$0xff] (!%p1421_p7), %vm1105_vm3, %v1964_v55 }
 0x283   : > { %v1968_v57 = vpop.xlane.xlu1 %1061  ;;  %v1970_v58 = vpop.xlane.xlu0 %1037 }
 0x284   : > { %1106 = vst.msk [vmem:[#allocation2] sm:$0xff] (!%p1421_p7), %vm1105_vm3, %v1970_v58  ;;  %1118 = vst.msk [vmem:[#allocation2 + $0x60] sm:$0xff] (!%p1421_p7), %vm1105_vm3, %v1968_v57 }
 0x287   : > { %v1972_v59 = vpop.xlane.xlu1 %1039  ;;  %v1974_v60 = vpop.xlane.xlu0 %1043 }
 0x288   : > { %1107 = vst.msk [vmem:[#allocation2 + $0x8] sm:$0xff] (!%p1421_p7), %vm1105_vm3, %v1972_v59  ;;  %1109 = vst.msk [vmem:[#allocation2 + $0x18] sm:$0xff] (!%p1421_p7), %vm1105_vm3, %v1974_v60 }
 0x28b   : > { %v1976_v61 = vpop.xlane.xlu1 %1049  ;;  %v1978_v62 = vpop.xlane.xlu0 %1067 }
 0x28c   : > { %1112 = vst.msk [vmem:[#allocation2 + $0x30] sm:$0xff] (!%p1421_p7), %vm1105_vm3, %v1976_v61  ;;  %1121 = vst.msk [vmem:[#allocation2 + $0x78] sm:$0xff] (!%p1421_p7), %vm1105_vm3, %v1978_v62 }
 0x28f   : > { %v1980_v63 = vpop.xlane.xlu1 %1073  ;;  %v1982_v0 = vpop.xlane.xlu0 %1063 }
 0x290   : > { %1119 = vst.msk [vmem:[#allocation2 + $0x68] sm:$0xff] (!%p1421_p7), %vm1105_vm3, %v1982_v0  ;;  %1124 = vst.msk [vmem:[#allocation2 + $0x90] sm:$0xff] (!%p1421_p7), %vm1105_vm3, %v1980_v63 }
 0x293   : > { %v1984_v1 = vpop.xlane.xlu1 %1045  ;;  %v1986_v2 = vpop.xlane.xlu0 %1051 }
 0x294   : > { %1110 = vst.msk [vmem:[#allocation2 + $0x20] sm:$0xff] (!%p1421_p7), %vm1105_vm3, %v1984_v1  ;;  %1113 = vst.msk [vmem:[#allocation2 + $0x38] sm:$0xff] (!%p1421_p7), %vm1105_vm3, %v1986_v2 }
 0x297   : > { %v1988_v3 = vpop.xlane.xlu1 %1069  ;;  %v1990_v4 = vpop.xlane.xlu0 %1075 }
 0x298   : > { %1122 = vst.msk [vmem:[#allocation2 + $0x80] sm:$0xff] (!%p1421_p7), %vm1105_vm3, %v1988_v3  ;;  %1125 = vst.msk [vmem:[#allocation2 + $0x98] sm:$0xff] (!%p1421_p7), %vm1105_vm3, %v1990_v4 }
 0x29b   : > { %v1992_v5 = vpop.xlane.xlu1 %1057  ;;  %v1994_v6 = vpop.xlane.xlu0 %1047 }
 0x29c   : > { %1111 = vst.msk [vmem:[#allocation2 + $0x28] sm:$0xff] (!%p1421_p7), %vm1105_vm3, %v1994_v6  ;;  %1116 = vst.msk [vmem:[#allocation2 + $0x50] sm:$0xff] (!%p1421_p7), %vm1105_vm3, %v1992_v5 }
 0x29f   : > { %v1996_v7 = vpop.xlane.xlu1 %1081  ;;  %v1998_v8 = vpop.xlane.xlu0 %1071 }
 0x2a0   : > { %1123 = vst.msk [vmem:[#allocation2 + $0x88] sm:$0xff] (!%p1421_p7), %vm1105_vm3, %v1998_v8  ;;  %1128 = vst.msk [vmem:[#allocation2 + $0xb0] sm:$0xff] (!%p1421_p7), %vm1105_vm3, %v1996_v7 }
 0x2a3   : > { %v2000_v9 = vpop.xlane.xlu1 %1053  ;;  %v2002_v10 = vpop.xlane.xlu0 %1059 }
 0x2a4   : > { %1114 = vst.msk [vmem:[#allocation2 + $0x40] sm:$0xff] (!%p1421_p7), %vm1105_vm3, %v2000_v9  ;;  %1117 = vst.msk [vmem:[#allocation2 + $0x58] sm:$0xff] (!%p1421_p7), %vm1105_vm3, %v2002_v10 }
 0x2a7   : > { %v2004_v11 = vpop.xlane.xlu1 %1077  ;;  %v2006_v12 = vpop.xlane.xlu0 %1083 }
 0x2a8   : > { %1126 = vst.msk [vmem:[#allocation2 + $0xa0] sm:$0xff] (!%p1421_p7), %vm1105_vm3, %v2004_v11  ;;  %1129 = vst.msk [vmem:[#allocation2 + $0xb8] sm:$0xff] (!%p1421_p7), %vm1105_vm3, %v2006_v12 }
 0x2ab   : > { %v2008_v13 = vpop.xlane.xlu1 %1089  ;;  %v2010_v14 = vpop.xlane.xlu0 %1055 }
 0x2ac   : > { %1115 = vst.msk [vmem:[#allocation2 + $0x48] sm:$0xff] (!%p1421_p7), %vm1105_vm3, %v2010_v14  ;;  %1132 = vst.msk [vmem:[#allocation2 + $0xd0] sm:$0xff] (!%p1421_p7), %vm1105_vm3, %v2008_v13 }
 0x2af   : > { %v2012_v15 = vpop.xlane.xlu1 %1085  ;;  %v2014_v16 = vpop.xlane.xlu0 %1079 }
 0x2b0   : > { %1127 = vst.msk [vmem:[#allocation2 + $0xa8] sm:$0xff] (!%p1421_p7), %vm1105_vm3, %v2014_v16  ;;  %1130 = vst.msk [vmem:[#allocation2 + $0xc0] sm:$0xff] (!%p1421_p7), %vm1105_vm3, %v2012_v15 }
 0x2b3   : > { %v2016_v17 = vpop.xlane.xlu1 %1093  ;;  %v2018_v18 = vpop.xlane.xlu0 %1091 }
 0x2b4   : > { %1133 = vst.msk [vmem:[#allocation2 + $0xd8] sm:$0xff] (!%p1421_p7), %vm1105_vm3, %v2018_v18  ;;  %1134 = vst.msk [vmem:[#allocation2 + $0xe0] sm:$0xff] (!%p1421_p7), %vm1105_vm3, %v2016_v17 }
 0x2b7   : > { %v2020_v19 = vpop.xlane.xlu1 %1097  ;;  %v2022_v20 = vpop.xlane.xlu0 %1087 }
 0x2b8   : > { %1131 = vst.msk [vmem:[#allocation2 + $0xc8] sm:$0xff] (!%p1421_p7), %vm1105_vm3, %v2022_v20  ;;  %1136 = vst.msk [vmem:[#allocation2 + $0xf0] sm:$0xff] (!%p1421_p7), %vm1105_vm3, %v2020_v19 }
 0x2b9   : > { %1104 = sbr.rel (%p1421_p7) target bundleno = 705 (0x2c1), region = 44 }
 0x2bb   : > { %v2024_v21 = vpop.xlane.xlu0 %1095 }
 0x2bc   : > { %1135 = vst.msk [vmem:[#allocation2 + $0xe8] sm:$0xff] (!%p1421_p7), %vm1105_vm3, %v2024_v21 }
 0x2bf   : > { %v2026_v22 = vpop.xlane.xlu0 %1099 }
 0x2c0   : > { %1137 = vst.msk [vmem:[#allocation2 + $0xf8] sm:$0xff] %vm1105_vm3, %v2026_v22 }
 0x2c1 PF: > { %p1422_p8 = scmp.le.s32.totalorder %s1632_s18, 0 }
 0x2c2   : > { %v1142_v23 = vld [vmem:[#allocation2] sm:$0xff] (!%p1422_p8)  ;;  %vm1206_vm4 = vcmask (!%p1422_p8), 7168   ;;  %v1143_v24 = vld [vmem:[#allocation2 + $0x8] sm:$0xff] (!%p1422_p8)  ;;  %v1144_v25 = vld [vmem:[#allocation2 + $0x10] sm:$0xff] (!%p1422_p8) }
 0x2c3   : > { %1141 = sbr.rel (%p1422_p8) target bundleno = 725 (0x2d5), region = 48  ;;  %v1174_v26 = vmax.f32 (!%p1422_p8), %v1142_v23, %v1970_v58  ;;  %v1175_v27 = vmax.f32 (!%p1422_p8), %v1143_v24, %v1972_v59  ;;  %v1176_v29 = vmax.f32 (!%p1422_p8), %v1144_v25, %v1966_v56  ;;  %v1145_v30 = vld [vmem:[#allocation2 + $0x18] sm:$0xff] (!%p1422_p8)  ;;  %v1146_v35 = vld [vmem:[#allocation2 + $0x20] sm:$0xff] (!%p1422_p8)  ;;  %v1147_v36 = vld [vmem:[#allocation2 + $0x28] sm:$0xff] (!%p1422_p8) }
 0x2c4   : > { %v1177_v37 = vmax.f32 (!%p1422_p8), %v1145_v30, %v1974_v60  ;;  %v1178_v38 = vmax.f32 (!%p1422_p8), %v1146_v35, %v1984_v1  ;;  %v1179_v39 = vmax.f32 (!%p1422_p8), %v1147_v36, %v1994_v6  ;;  %v1148_v28 = vld [vmem:[#allocation2 + $0x30] sm:$0xff] (!%p1422_p8)  ;;  %v1149_v33 = vld [vmem:[#allocation2 + $0x38] sm:$0xff] (!%p1422_p8)  ;;  %v1150_v40 = vld [vmem:[#allocation2 + $0x40] sm:$0xff] (!%p1422_p8) }
 0x2c5   : > { %1207 = vst.msk [vmem:[#allocation2] sm:$0xff] (!%p1422_p8), %vm1206_vm4, %v1174_v26  ;;  %1208 = vst.msk [vmem:[#allocation2 + $0x8] sm:$0xff] (!%p1422_p8), %vm1206_vm4, %v1175_v27  ;;  %v1180_v41 = vmax.f32 (!%p1422_p8), %v1148_v28, %v1976_v61  ;;  %v1181_v42 = vmax.f32 (!%p1422_p8), %v1149_v33, %v1986_v2  ;;  %v1182_v43 = vmax.f32 (!%p1422_p8), %v1150_v40, %v2000_v9  ;;  %v1151_v44 = vld [vmem:[#allocation2 + $0x48] sm:$0xff] (!%p1422_p8)  ;;  %v1152_v45 = vld [vmem:[#allocation2 + $0x50] sm:$0xff] (!%p1422_p8) }
 0x2c6   : > { %1209 = vst.msk [vmem:[#allocation2 + $0x10] sm:$0xff] (!%p1422_p8), %vm1206_vm4, %v1176_v29  ;;  %v1153_v46 = vld [vmem:[#allocation2 + $0x58] sm:$0xff] (!%p1422_p8)  ;;  %1210 = vst.msk [vmem:[#allocation2 + $0x18] sm:$0xff] (!%p1422_p8), %vm1206_vm4, %v1177_v37  ;;  %v1183_v31 = vmax.f32 (!%p1422_p8), %v1151_v44, %v2010_v14  ;;  %v1184_v34 = vmax.f32 (!%p1422_p8), %v1152_v45, %v1992_v5  ;;  %v1154_v48 = vld [vmem:[#allocation2 + $0x60] sm:$0xff] (!%p1422_p8) }
 0x2c7   : > { %1211 = vst.msk [vmem:[#allocation2 + $0x20] sm:$0xff] (!%p1422_p8), %vm1206_vm4, %v1178_v38  ;;  %1212 = vst.msk [vmem:[#allocation2 + $0x28] sm:$0xff] (!%p1422_p8), %vm1206_vm4, %v1179_v39  ;;  %v1185_v47 = vmax.f32 (!%p1422_p8), %v1153_v46, %v2002_v10  ;;  %v1155_v49 = vld [vmem:[#allocation2 + $0x68] sm:$0xff] (!%p1422_p8)  ;;  %v1156_v50 = vld [vmem:[#allocation2 + $0x70] sm:$0xff] (!%p1422_p8)  ;;  %v1186_v51 = vmax.f32 (!%p1422_p8), %v1154_v48, %v1968_v57 }
 0x2c8   : > { %1213 = vst.msk [vmem:[#allocation2 + $0x30] sm:$0xff] (!%p1422_p8), %vm1206_vm4, %v1180_v41  ;;  %1214 = vst.msk [vmem:[#allocation2 + $0x38] sm:$0xff] (!%p1422_p8), %vm1206_vm4, %v1181_v42  ;;  %v1187_v52 = vmax.f32 (!%p1422_p8), %v1155_v49, %v1982_v0  ;;  %v1188_v32 = vmax.f32 (!%p1422_p8), %v1156_v50, %v1964_v55  ;;  %v1157_v53 = vld [vmem:[#allocation2 + $0x78] sm:$0xff] (!%p1422_p8)  ;;  %v1158_v54 = vld [vmem:[#allocation2 + $0x80] sm:$0xff] (!%p1422_p8) }
 0x2c9   : > { %1215 = vst.msk [vmem:[#allocation2 + $0x40] sm:$0xff] (!%p1422_p8), %vm1206_vm4, %v1182_v43  ;;  %v1159_v56 = vld [vmem:[#allocation2 + $0x88] sm:$0xff] (!%p1422_p8)  ;;  %1216 = vst.msk [vmem:[#allocation2 + $0x48] sm:$0xff] (!%p1422_p8), %vm1206_vm4, %v1183_v31  ;;  %v1189_v58 = vmax.f32 (!%p1422_p8), %v1157_v53, %v1978_v62  ;;  %v1190_v59 = vmax.f32 (!%p1422_p8), %v1158_v54, %v1988_v3  ;;  %v1160_v57 = vld [vmem:[#allocation2 + $0x90] sm:$0xff] (!%p1422_p8) }
 0x2ca   : > { %1217 = vst.msk [vmem:[#allocation2 + $0x50] sm:$0xff] %vm1206_vm4, %v1184_v34  ;;  %1218 = vst.msk [vmem:[#allocation2 + $0x58] sm:$0xff] %vm1206_vm4, %v1185_v47  ;;  %v1191_v60 = vmax.f32 %v1159_v56, %v1998_v8  ;;  %v1161_v61 = vld [vmem:[#allocation2 + $0x98] sm:$0xff]  ;;  %v1162_v0 = vld [vmem:[#allocation2 + $0xa0] sm:$0xff]  ;;  %v1192_v55 = vmax.f32 %v1160_v57, %v1980_v63 }
 0x2cb   : > { %1219 = vst.msk [vmem:[#allocation2 + $0x60] sm:$0xff] %vm1206_vm4, %v1186_v51  ;;  %1220 = vst.msk [vmem:[#allocation2 + $0x68] sm:$0xff] %vm1206_vm4, %v1187_v52  ;;  %v1193_v1 = vmax.f32 %v1161_v61, %v1990_v4  ;;  %v1194_v2 = vmax.f32 %v1162_v0, %v2004_v11  ;;  %v1163_v62 = vld [vmem:[#allocation2 + $0xa8] sm:$0xff]  ;;  %v1164_v5 = vld [vmem:[#allocation2 + $0xb0] sm:$0xff] }
 0x2cc   : > { %1221 = vst.msk [vmem:[#allocation2 + $0x70] sm:$0xff] %vm1206_vm4, %v1188_v32  ;;  %v1165_v3 = vld [vmem:[#allocation2 + $0xb8] sm:$0xff]  ;;  %1222 = vst.msk [vmem:[#allocation2 + $0x78] sm:$0xff] %vm1206_vm4, %v1189_v58  ;;  %v1195_v6 = vmax.f32 %v1163_v62, %v2014_v16  ;;  %v1196_v8 = vmax.f32 %v1164_v5, %v1996_v7  ;;  %v1166_v63 = vld [vmem:[#allocation2 + $0xc0] sm:$0xff] }
 0x2cd   : > { %1223 = vst.msk [vmem:[#allocation2 + $0x80] sm:$0xff] %vm1206_vm4, %v1190_v59  ;;  %1224 = vst.msk [vmem:[#allocation2 + $0x88] sm:$0xff] %vm1206_vm4, %v1191_v60  ;;  %v1197_v9 = vmax.f32 %v1165_v3, %v2006_v12  ;;  %v1167_v10 = vld [vmem:[#allocation2 + $0xc8] sm:$0xff]  ;;  %v1168_v4 = vld [vmem:[#allocation2 + $0xd0] sm:$0xff]  ;;  %v1198_v11 = vmax.f32 %v1166_v63, %v2012_v15 }
 0x2ce   : > { %1225 = vst.msk [vmem:[#allocation2 + $0x90] sm:$0xff] %vm1206_vm4, %v1192_v55  ;;  %1226 = vst.msk [vmem:[#allocation2 + $0x98] sm:$0xff] %vm1206_vm4, %v1193_v1  ;;  %v1199_v14 = vmax.f32 %v1167_v10, %v2022_v20  ;;  %v1200_v23 = vmax.f32 %v1168_v4, %v2008_v13  ;;  %v1169_v16 = vld [vmem:[#allocation2 + $0xd8] sm:$0xff]  ;;  %v1170_v24 = vld [vmem:[#allocation2 + $0xe0] sm:$0xff] }
 0x2cf   : > { %1227 = vst.msk [vmem:[#allocation2 + $0xa0] sm:$0xff] %vm1206_vm4, %v1194_v2  ;;  %v1171_v7 = vld [vmem:[#allocation2 + $0xe8] sm:$0xff]  ;;  %1228 = vst.msk [vmem:[#allocation2 + $0xa8] sm:$0xff] %vm1206_vm4, %v1195_v6  ;;  %v1201_v12 = vmax.f32 %v1169_v16, %v2018_v18  ;;  %v1202_v25 = vmax.f32 %v1170_v24, %v2016_v17  ;;  %v1172_v15 = vld [vmem:[#allocation2 + $0xf0] sm:$0xff] }
 0x2d0   : > { %1229 = vst.msk [vmem:[#allocation2 + $0xb0] sm:$0xff] %vm1206_vm4, %v1196_v8  ;;  %1230 = vst.msk [vmem:[#allocation2 + $0xb8] sm:$0xff] %vm1206_vm4, %v1197_v9  ;;  %v1203_v26 = vmax.f32 %v1171_v7, %v2024_v21  ;;  %v1173_v27 = vld [vmem:[#allocation2 + $0xf8] sm:$0xff]  ;;  %v1204_v13 = vmax.f32 %v1172_v15, %v2020_v19 }
 0x2d1   : > { %1231 = vst.msk [vmem:[#allocation2 + $0xc0] sm:$0xff] %vm1206_vm4, %v1198_v11  ;;  %1232 = vst.msk [vmem:[#allocation2 + $0xc8] sm:$0xff] %vm1206_vm4, %v1199_v14  ;;  %v1205_v20 = vmax.f32 %v1173_v27, %v2026_v22 }
 0x2d2   : > { %1233 = vst.msk [vmem:[#allocation2 + $0xd0] sm:$0xff] %vm1206_vm4, %v1200_v23  ;;  %1234 = vst.msk [vmem:[#allocation2 + $0xd8] sm:$0xff] %vm1206_vm4, %v1201_v12 }
 0x2d3   : > { %1235 = vst.msk [vmem:[#allocation2 + $0xe0] sm:$0xff] %vm1206_vm4, %v1202_v25  ;;  %1236 = vst.msk [vmem:[#allocation2 + $0xe8] sm:$0xff] %vm1206_vm4, %v1203_v26 }
 0x2d4   : > { %1237 = vst.msk [vmem:[#allocation2 + $0xf0] sm:$0xff] %vm1206_vm4, %v1204_v13  ;;  %1238 = vst.msk [vmem:[#allocation2 + $0xf8] sm:$0xff] %vm1206_vm4, %v1205_v20 }
 0x2d5 PF: > { %p1423_p9 = scmp.ne.s32.totalorder %s1632_s18, 1 }
 0x2d6   : > { %vm1275_vm5 = vcmask (!%p1423_p9), 7168   ;;  %v1255_v28 = vld [vmem:[#allocation2 + $0x60] sm:$0xff] (!%p1423_p9)  ;;  %v1256_v33 = vld [vmem:[#allocation2 + $0x68] sm:$0xff] (!%p1423_p9)  ;;  %v1257_v40 = vld [vmem:[#allocation2 + $0x70] sm:$0xff] (!%p1423_p9) }
 0x2d7   : > { %1242 = sbr.rel (%p1423_p9) target bundleno = 743 (0x2e7), region = 52  ;;  %v1243_v17 = vld [vmem:[#allocation2] sm:$0xff] (!%p1423_p9)  ;;  %v1244_v18 = vld [vmem:[#allocation2 + $0x8] sm:$0xff] (!%p1423_p9)  ;;  %1288 = vst.msk [vmem:[%s1735_s16 + $0x60] sm:$0xff] (!%p1423_p9), %vm1275_vm5, %v1255_v28  ;;  %1289 = vst.msk [vmem:[%s1735_s16 + $0x68] sm:$0xff] (!%p1423_p9), %vm1275_vm5, %v1256_v33 }
 0x2d8   : > { %v1245_v19 = vld [vmem:[#allocation2 + $0x10] sm:$0xff] (!%p1423_p9)  ;;  %1276 = vst.msk [vmem:[%s1735_s16] sm:$0xff] (!%p1423_p9), %vm1275_vm5, %v1243_v17  ;;  %1277 = vst.msk [vmem:[%s1735_s16 + $0x8] sm:$0xff] (!%p1423_p9), %vm1275_vm5, %v1244_v18  ;;  %v1246_v21 = vld [vmem:[#allocation2 + $0x18] sm:$0xff] (!%p1423_p9) }
 0x2d9   : > { %1278 = vst.msk [vmem:[%s1735_s16 + $0x10] sm:$0xff] (!%p1423_p9), %vm1275_vm5, %v1245_v19  ;;  %v1247_v22 = vld [vmem:[#allocation2 + $0x20] sm:$0xff] (!%p1423_p9)  ;;  %v1248_v29 = vld [vmem:[#allocation2 + $0x28] sm:$0xff] (!%p1423_p9)  ;;  %1279 = vst.msk [vmem:[%s1735_s16 + $0x18] sm:$0xff] (!%p1423_p9), %vm1275_vm5, %v1246_v21 }
 0x2da   : > { %1280 = vst.msk [vmem:[%s1735_s16 + $0x20] sm:$0xff] (!%p1423_p9), %vm1275_vm5, %v1247_v22  ;;  %1281 = vst.msk [vmem:[%s1735_s16 + $0x28] sm:$0xff] (!%p1423_p9), %vm1275_vm5, %v1248_v29  ;;  %v1249_v30 = vld [vmem:[#allocation2 + $0x30] sm:$0xff] (!%p1423_p9)  ;;  %v1250_v35 = vld [vmem:[#allocation2 + $0x38] sm:$0xff] (!%p1423_p9) }
 0x2db   : > { %v1251_v36 = vld [vmem:[#allocation2 + $0x40] sm:$0xff] (!%p1423_p9)  ;;  %1282 = vst.msk [vmem:[%s1735_s16 + $0x30] sm:$0xff] (!%p1423_p9), %vm1275_vm5, %v1249_v30  ;;  %1283 = vst.msk [vmem:[%s1735_s16 + $0x38] sm:$0xff] (!%p1423_p9), %vm1275_vm5, %v1250_v35  ;;  %v1252_v37 = vld [vmem:[#allocation2 + $0x48] sm:$0xff] (!%p1423_p9) }
 0x2dc   : > { %1284 = vst.msk [vmem:[%s1735_s16 + $0x40] sm:$0xff] (!%p1423_p9), %vm1275_vm5, %v1251_v36  ;;  %v1253_v38 = vld [vmem:[#allocation2 + $0x50] sm:$0xff] (!%p1423_p9)  ;;  %v1254_v39 = vld [vmem:[#allocation2 + $0x58] sm:$0xff] (!%p1423_p9)  ;;  %1285 = vst.msk [vmem:[%s1735_s16 + $0x48] sm:$0xff] (!%p1423_p9), %vm1275_vm5, %v1252_v37 }
 0x2dd   : > { %1286 = vst.msk [vmem:[%s1735_s16 + $0x50] sm:$0xff] (!%p1423_p9), %vm1275_vm5, %v1253_v38  ;;  %1287 = vst.msk [vmem:[%s1735_s16 + $0x58] sm:$0xff] (!%p1423_p9), %vm1275_vm5, %v1254_v39  ;;  %v1258_v41 = vld [vmem:[#allocation2 + $0x78] sm:$0xff] (!%p1423_p9)  ;;  %v1259_v42 = vld [vmem:[#allocation2 + $0x80] sm:$0xff] (!%p1423_p9) }
 0x2de   : > { %1290 = vst.msk [vmem:[%s1735_s16 + $0x70] sm:$0xff] %vm1275_vm5, %v1257_v40  ;;  %v1260_v43 = vld [vmem:[#allocation2 + $0x88] sm:$0xff]  ;;  %1291 = vst.msk [vmem:[%s1735_s16 + $0x78] sm:$0xff] %vm1275_vm5, %v1258_v41  ;;  %v1261_v44 = vld [vmem:[#allocation2 + $0x90] sm:$0xff] }
 0x2df   : > { %1292 = vst.msk [vmem:[%s1735_s16 + $0x80] sm:$0xff] %vm1275_vm5, %v1259_v42  ;;  %1293 = vst.msk [vmem:[%s1735_s16 + $0x88] sm:$0xff] %vm1275_vm5, %v1260_v43  ;;  %v1262_v45 = vld [vmem:[#allocation2 + $0x98] sm:$0xff]  ;;  %v1263_v46 = vld [vmem:[#allocation2 + $0xa0] sm:$0xff] }
 0x2e0   : > { %1294 = vst.msk [vmem:[%s1735_s16 + $0x90] sm:$0xff] %vm1275_vm5, %v1261_v44  ;;  %1295 = vst.msk [vmem:[%s1735_s16 + $0x98] sm:$0xff] %vm1275_vm5, %v1262_v45  ;;  %v1264_v31 = vld [vmem:[#allocation2 + $0xa8] sm:$0xff]  ;;  %v1265_v34 = vld [vmem:[#allocation2 + $0xb0] sm:$0xff] }
 0x2e1   : > { %1296 = vst.msk [vmem:[%s1735_s16 + $0xa0] sm:$0xff] %vm1275_vm5, %v1263_v46  ;;  %v1266_v47 = vld [vmem:[#allocation2 + $0xb8] sm:$0xff]  ;;  %1297 = vst.msk [vmem:[%s1735_s16 + $0xa8] sm:$0xff] %vm1275_vm5, %v1264_v31  ;;  %v1267_v48 = vld [vmem:[#allocation2 + $0xc0] sm:$0xff] }
 0x2e2   : > { %1298 = vst.msk [vmem:[%s1735_s16 + $0xb0] sm:$0xff] %vm1275_vm5, %v1265_v34  ;;  %1299 = vst.msk [vmem:[%s1735_s16 + $0xb8] sm:$0xff] %vm1275_vm5, %v1266_v47  ;;  %v1268_v49 = vld [vmem:[#allocation2 + $0xc8] sm:$0xff]  ;;  %v1269_v50 = vld [vmem:[#allocation2 + $0xd0] sm:$0xff] }
 0x2e3   : > { %1300 = vst.msk [vmem:[%s1735_s16 + $0xc0] sm:$0xff] %vm1275_vm5, %v1267_v48  ;;  %1301 = vst.msk [vmem:[%s1735_s16 + $0xc8] sm:$0xff] %vm1275_vm5, %v1268_v49  ;;  %v1270_v51 = vld [vmem:[#allocation2 + $0xd8] sm:$0xff]  ;;  %v1271_v52 = vld [vmem:[#allocation2 + $0xe0] sm:$0xff] }
 0x2e4   : > { %1302 = vst.msk [vmem:[%s1735_s16 + $0xd0] sm:$0xff] %vm1275_vm5, %v1269_v50  ;;  %v1272_v32 = vld [vmem:[#allocation2 + $0xe8] sm:$0xff]  ;;  %1303 = vst.msk [vmem:[%s1735_s16 + $0xd8] sm:$0xff] %vm1275_vm5, %v1270_v51  ;;  %v1273_v53 = vld [vmem:[#allocation2 + $0xf0] sm:$0xff] }
 0x2e5   : > { %1304 = vst.msk [vmem:[%s1735_s16 + $0xe0] sm:$0xff] %vm1275_vm5, %v1271_v52  ;;  %1305 = vst.msk [vmem:[%s1735_s16 + $0xe8] sm:$0xff] %vm1275_vm5, %v1272_v32  ;;  %v1274_v54 = vld [vmem:[#allocation2 + $0xf8] sm:$0xff] }
 0x2e6   : > { %1306 = vst.msk [vmem:[%s1735_s16 + $0xf0] sm:$0xff] %vm1275_vm5, %v1273_v53  ;;  %1307 = vst.msk [vmem:[%s1735_s16 + $0xf8] sm:$0xff] %vm1275_vm5, %v1274_v54 }
 0x2e7 PF: > { %s15_s22 = sadd.s32 1, %s1648_s22   ;;  %s2244_s18 = smov %s1640_s20 }
 0x2e8   : > { %p12_p10 = scmp.ge.s32.totalorder %s15_s22, 6   ;;  %s2245_s19 = smov %s1644_s21 }
 0x2e9   : > { %s2246_s20 = smov %s2249_s23  ;;  %s2247_s21 = smov %s2253_s24 }
 0x2ea   :  { %14 = sbr.rel (!%p12_p10) target bundleno = 3 (0x3), region = 82 }

</bundles_post_ra>
